<compile_context>
chip_gen: v7x
topology: tpu7x:2x2x1
jax: 0.10.0
libtpu: 0.0.40
codegen_flags: <defaults>
</compile_context>

<pallas_src>
import functools

import jax
import jax.numpy as jnp
from jax import lax
from jax.experimental import pallas as pl
from jax.experimental.pallas import tpu as pltpu


def _round_up(x, m):
    return ((x + m - 1) // m) * m


def _vmem_capacity_bytes():
    """Best-effort physical VMEM query (v7x: 64 MiB, v5e/v6e: 128 MiB)."""
    try:
        info = pltpu.get_tpu_info()
        return int(getattr(info, "vmem_capacity_bytes", 64 << 20))
    except Exception:
        return 64 << 20


def _qnet_fused_kernel(embed_ref, seg_ref, gemb_ref, w1a_ref, w1b_ref, bnp_ref,
                       w2_ref, b2_ref, out_ref,
                       gc_ref, stat_ref, c_ref, hcache_ref,
                       *, n_valid, n_tile0, n_total, eps, cache_h):
    """Fused QNet head.

    Grid is (phase, tile); both axes "arbitrary" (carried scratch).

    embed_ref : [TN, D]      node embeddings, natural node-major layout
    seg_ref   : [1, TN]      graph id per node (tail of last block undefined)
    gemb_ref  : [B_pad, D]   graph embeddings (zero padded rows)
    w1a_ref   : [H, D]       linear_1 weight half applied to node embeddings
    w1b_ref   : [H, D]       linear_1 weight half applied to graph embeddings
    bnp_ref   : [H, 3]       packed [b1 | gamma | beta]  (f32)
    w2_ref    : [H, 1]       linear_out weight (f32)
    b2_ref    : [1, 1]       linear_out bias (f32)
    out_ref   : [1, TN]      lane-dense raw_pred tile (written in phase 1 only)
    gc_ref    : [H, B_pad]   scratch: W1b @ gemb^T + b1
    stat_ref  : [H, 2]       scratch: [sum(h-c) | sum((h-c)^2)] -> [scale | shift]
    c_ref     : [H, 1]       scratch: per-feature shift (first-tile mean)
    hcache_ref: [T, H, TN]   scratch: resident pre-BN h (only when cache_h)
    """
    p = pl.program_id(0)          # 0 = stats sweep, 1 = normalize + output
    t = pl.program_id(1)          # node tile
    b_pad = gc_ref.shape[1]
    tn = out_ref.shape[1]

    def compute_h():
        # h[H, TN] = W1a @ emb^T + (W1b @ gemb^T + b1) @ onehot
        # dot_general contracts on D, so Mosaic does the [TN, D] -> [D, TN]
        # relayout in-kernel (XLU slot) — no host transpose / extra HBM pass.
        onehot = (lax.broadcasted_iota(jnp.int32, (b_pad, tn), 0)
                  == seg_ref[...]).astype(jnp.float32)                 # [B_pad, TN]
        h = lax.dot_general(w1a_ref[...], embed_ref[...],
                            dimension_numbers=(((1,), (1,)), ((), ())),
                            preferred_element_type=jnp.float32)        # [H, TN]
        return h + jnp.dot(gc_ref[...], onehot,
                           preferred_element_type=jnp.float32)

    @pl.when(p == 0)
    def _phase0():
        @pl.when(t == 0)
        def _():
            stat_ref[...] = jnp.zeros_like(stat_ref)
            gc_ref[...] = (lax.dot_general(
                w1b_ref[...], gemb_ref[...],
                dimension_numbers=(((1,), (1,)), ((), ())),
                preferred_element_type=jnp.float32)
                + bnp_ref[:, 0:1])                                     # + b1

        h = compute_h()

        # Tail rows of the last (partial) block read undefined data; select
        # with `where` (not a 0/1 multiply) so NaN/Inf garbage cannot leak
        # into the BatchNorm statistics.
        col = lax.broadcasted_iota(jnp.int32, (1, tn), 1) + t * tn
        valid = col < n_total

        @pl.when(t == 0)
        def _():
            # Per-feature shift ~= first-tile mean; accumulating around it
            # avoids E[h^2]-E[h]^2 cancellation for large N.
            c_ref[...] = (jnp.sum(jnp.where(valid, h, 0.0), axis=1,
                                  keepdims=True) * (1.0 / n_tile0))

        hm = jnp.where(valid, h - c_ref[...], 0.0)
        stat_ref[:, 0:1] += jnp.sum(hm, axis=1, keepdims=True)
        stat_ref[:, 1:2] += jnp.sum(hm * hm, axis=1, keepdims=True)

        if cache_h:
            hcache_ref[t] = h        # pre-BN activations stay resident in VMEM

        @pl.when(t == pl.num_programs(1) - 1)
        def _():
            inv_n = 1.0 / n_valid
            m1 = stat_ref[:, 0:1] * inv_n
            var = jnp.maximum(stat_ref[:, 1:2] * inv_n - m1 * m1, 0.0)
            mean = c_ref[...] + m1
            scale = bnp_ref[:, 1:2] * lax.rsqrt(var + eps)   # gamma/sqrt(var+eps)
            # Repack stat_ref in place as [scale | shift] for phase 1.
            stat_ref[:, 0:1] = scale
            stat_ref[:, 1:2] = bnp_ref[:, 2:3] - mean * scale

    @pl.when(p == 1)
    def _phase1():
        scale = stat_ref[:, 0:1]
        shift = stat_ref[:, 1:2]
        if cache_h:
            h = hcache_ref[t]
        else:
            h = compute_h()          # fallback: embed re-read, h recomputed
        ha = jnp.maximum(h * scale + shift, 0.0)             # fused BN + relu
        # linear_out is a single output column: VPU multiply + sublane reduce,
        # lane-dense [1, TN] store (no [N,1] masked partial stores).
        out_ref[...] = (jnp.sum(ha * w2_ref[...], axis=0, keepdims=True)
                        + b2_ref[...])


@functools.partial(jax.jit, static_argnames=("tile_n", "eps", "cache_h"))
def qnet_head(embed, graph_embed, seg_ids, w1, b1, gamma, beta, w2, b2,
              *, tile_n=4096, eps=1e-5, cache_h=None):
    """QNet head forward.

    embed        [N, D]  : per-node s2v embeddings (f32 or bf16 — streamed as-is)
    graph_embed  [B, D]  : per-graph s2v embeddings
    seg_ids      [N] i32 : graph id of each node (replaces rep_global_embed)
    w1 [2D, H], b1 [H]   : linear_1 (weight.T layout)
    gamma [H], beta [H]  : BatchNorm1d affine (training-mode batch statistics)
    w2 [H, 1], b2 [1]    : linear_out (weight.T layout)
    cache_h              : None = auto (cache pre-BN h in VMEM when it fits)
    returns raw_pred [N, 1] float32
    """
    N, D = embed.shape
    B = graph_embed.shape[0]
    H = w1.shape[1]
    f32 = jnp.float32
    cdtype = embed.dtype               # HBM streaming dtype for the big operand

    tile_n = max(128, (int(tile_n) // 128) * 128)
    eff_tile = min(tile_n, _round_up(N, 128))
    num_tiles = (N + eff_tile - 1) // eff_tile
    n_pad = num_tiles * eff_tile
    b_pad = _round_up(B, 8)

    vmem_cap = _vmem_capacity_bytes()
    cache_bytes = H * n_pad * 4
    if cache_h is None:
        cache_h = cache_bytes <= int(0.45 * vmem_cap)
    cache_h = bool(cache_h)
    vmem_limit = int(min(max(vmem_cap - (16 << 20), 32 << 20), 96 << 20))

    # Small / free host-side prep only — the big [N, D] operand is untouched.
    seg2d = seg_ids.astype(jnp.int32).reshape(1, N)
    gemb_p = jnp.zeros((b_pad, D), cdtype).at[:B].set(graph_embed.astype(cdtype))
    w1a = w1[:D, :].astype(cdtype).T                               # [H, D]
    w1b = w1[D:, :].astype(cdtype).T                               # [H, D]
    bnp = jnp.stack([b1, gamma, beta], axis=1).astype(f32)         # [H, 3]
    w2c = w2.reshape(H, 1).astype(f32)
    b2c = b2.reshape(1, 1).astype(f32)

    if cache_h:
        # Phase 1 consumes h from the VMEM cache -> collapse embed/seg block
        # indices to a constant so the pipeline dedups their DMAs.
        embed_map = lambda p, t: ((1 - p) * t, 0)
        seg_map = lambda p, t: (0, (1 - p) * t)
    else:
        embed_map = lambda p, t: (t, 0)
        seg_map = lambda p, t: (0, t)
    const = lambda p, t: (0, 0)
    # Output stays on block 0 during phase 0 (never written / never flushed),
    # then walks the tiles in phase 1 -> exactly one writeback per tile.
    out_map = lambda p, t: (0, p * t)

    kernel = functools.partial(
        _qnet_fused_kernel,
        n_valid=float(N), n_tile0=float(min(N, eff_tile)), n_total=N,
        eps=float(eps), cache_h=cache_h)

    out_pad = pl.pallas_call(
        kernel,
        out_shape=jax.ShapeDtypeStruct((1, n_pad), f32),
        grid_spec=pltpu.PrefetchScalarGridSpec(
            num_scalar_prefetch=0,
            grid=(2, num_tiles),                          # (phase, node tile)
            in_specs=[
                pl.BlockSpec((eff_tile, D), embed_map),
                pl.BlockSpec((1, eff_tile), seg_map),
                pl.BlockSpec((b_pad, D), const),
                pl.BlockSpec((H, D), const),
                pl.BlockSpec((H, D), const),
                pl.BlockSpec((H, 3), const),
                pl.BlockSpec((H, 1), const),
                pl.BlockSpec((1, 1), const),
            ],
            out_specs=pl.BlockSpec((1, eff_tile), out_map),
            scratch_shapes=[
                pltpu.VMEM((H, b_pad), f32),                         # gcontrib
                pltpu.VMEM((H, 2), f32),                             # sums -> scale/shift
                pltpu.VMEM((H, 1), f32),                             # shift c
                pltpu.VMEM((num_tiles, H, eff_tile) if cache_h
                           else (1, H, 128), f32),                   # resident h
            ],
        ),
        compiler_params=pltpu.CompilerParams(
            dimension_semantics=("arbitrary", "arbitrary"),
            vmem_limit_bytes=vmem_limit),
    )(embed, seg2d, gemb_p, w1a, w1b, bnp, w2c, b2c)

    return out_pad[0, :N].reshape(N, 1)


# ----------------------------- host-side glue -------------------------------

def segment_ids_from_nodes_per_graph(nodes_per_graph):
    """Glue mirroring prepare_node_features' prefix_sum bookkeeping."""
    n = int(sum(int(x) for x in nodes_per_graph))
    return jnp.repeat(jnp.arange(len(nodes_per_graph), dtype=jnp.int32),
                      jnp.asarray(nodes_per_graph, dtype=jnp.int32),
                      total_repeat_length=n)


def greedy_actions_from_q(raw_pred, seg_ids, nodes_per_graph):
    """JAX glue mirroring greedy_actions/jmax (no banned moves): per-graph
    local argmax node index and max q-value."""
    # TODO(synk): banned_list index_fill_ is host-side Python in the reference;
    # not implemented here.
    q = raw_pred[:, 0]
    B = len(nodes_per_graph)
    neg = jnp.finfo(q.dtype).min
    mask = seg_ids[None, :] == jnp.arange(B, dtype=seg_ids.dtype)[:, None]  # [B, N]
    qm = jnp.where(mask, q[None, :], neg)
    global_idx = jnp.argmax(qm, axis=1)
    values = jnp.max(qm, axis=1)
    starts = jnp.cumsum(
        jnp.asarray((0,) + tuple(nodes_per_graph)[:-1], dtype=jnp.int32))
    actions = global_idx.astype(jnp.int32) - starts
    return actions, values


if __name__ == "__main__":
    D = 32   # latent_dim
    H = 32   # hidden

    def make_case(nodes_per_graph, seed=0):
        B = len(nodes_per_graph)
        N = int(sum(nodes_per_graph))
        keys = jax.random.split(jax.random.PRNGKey(seed), 6)
        k_embed, k_gemb, k_w1, k_b1, k_w2, k_b2 = keys
        embed = jax.random.normal(k_embed, (N, D), dtype=jnp.float32)
        graph_embed = jax.random.normal(k_gemb, (B, D), dtype=jnp.float32)
        w1 = 0.1 * jax.random.normal(k_w1, (2 * D, H), dtype=jnp.float32)   # linear_1.weight.T
        b1 = 0.01 * jax.random.normal(k_b1, (H,), dtype=jnp.float32)
        w2 = 0.1 * jax.random.normal(k_w2, (H, 1), dtype=jnp.float32)       # linear_out.weight.T
        b2 = 0.01 * jax.random.normal(k_b2, (1,), dtype=jnp.float32)
        gamma = jnp.ones((H,), dtype=jnp.float32)                           # bn.weight
        beta = jnp.zeros((H,), dtype=jnp.float32)                           # bn.bias
        seg_ids = segment_ids_from_nodes_per_graph(nodes_per_graph)
        return embed, graph_embed, seg_ids, w1, b1, gamma, beta, w2, b2

    def reference(embed, graph_embed, seg_ids, w1, b1, gamma, beta, w2, b2, eps=1e-5):
        embed = embed.astype(jnp.float32)
        graph_embed = graph_embed.astype(jnp.float32)
        x = jnp.concatenate([embed, graph_embed[seg_ids]], axis=1)
        hh = x @ w1 + b1
        mu = jnp.mean(hh, axis=0, keepdims=True)
        vv = jnp.mean((hh - mu) ** 2, axis=0, keepdims=True)
        hh = (hh - mu) / jnp.sqrt(vv + eps) * gamma + beta
        return jnp.maximum(hh, 0.0) @ w2 + b2

    # Case 1: 2 ragged graphs, 16 nodes -> single 128-wide tile (exercises the
    # in-kernel tail masking), default tile size, h cached in VMEM.
    npg1 = (7, 9)
    args1 = make_case(npg1, seed=0)
    out1 = jax.block_until_ready(qnet_head(*args1))
    ref1 = reference(*args1)
    assert out1.shape == (sum(npg1), 1)
    assert jnp.allclose(out1, ref1, atol=1e-3, rtol=1e-3)

    # Case 2: 3 ragged graphs, 300 nodes, small tile -> multiple node tiles
    # (carried BN-stat accumulator + partial last block), fused single read.
    npg2 = (100, 60, 140)
    args2 = make_case(npg2, seed=1)
    out2 = jax.block_until_ready(qnet_head(*args2, tile_n=128))
    ref2 = reference(*args2)
    assert out2.shape == (sum(npg2), 1)
    assert jnp.allclose(out2, ref2, atol=1e-3, rtol=1e-3)

    # Case 2b: force the no-cache fallback (phase 1 re-reads embed, recomputes h).
    out2b = jax.block_until_ready(qnet_head(*args2, tile_n=128, cache_h=False))
    assert jnp.allclose(out2b, ref2, atol=1e-3, rtol=1e-3)

    # Case 2c: default (large) tile -> single tile covering all nodes.
    out2c = jax.block_until_ready(qnet_head(*args2))
    assert jnp.allclose(out2c, ref2, atol=1e-3, rtol=1e-3)

    # Case 3: bf16 streaming of the big HBM operands (weights cast to bf16 in
    # the wrapper); compare against an f32 reference on the bf16-rounded data.
    bf16 = jnp.bfloat16
    embed_b = args2[0].astype(bf16)
    gemb_b = args2[1].astype(bf16)
    out3 = jax.block_until_ready(
        qnet_head(embed_b, gemb_b, *args2[2:], tile_n=128))
    w1_r = args2[3].astype(bf16).astype(jnp.float32)
    ref3 = reference(embed_b, gemb_b, args2[2], w1_r, *args2[4:])
    assert jnp.allclose(out3, ref3, atol=2e-2, rtol=2e-2)

    # Greedy-action glue mirroring greedy_actions/jmax (no banned moves).
    actions, values = greedy_actions_from_q(out2, args2[2], npg2)
    jax.block_until_ready((actions, values))

    print("KERNEL_OK")
</pallas_src>

<mosaic_0001>
module attributes {stable_mosaic.version = 11 : i64} {
  func.func @_qnet_fused_kernel(%arg0: i32, %arg1: i32, %arg2: memref<128x32xf32, #tpu.memory_space<vmem>>, %arg3: memref<1x128xi32, #tpu.memory_space<vmem>>, %arg4: memref<8x32xf32, #tpu.memory_space<vmem>>, %arg5: memref<32x32xf32, #tpu.memory_space<vmem>>, %arg6: memref<32x32xf32, #tpu.memory_space<vmem>>, %arg7: memref<32x3xf32, #tpu.memory_space<vmem>>, %arg8: memref<32x1xf32, #tpu.memory_space<vmem>>, %arg9: memref<1x1xf32, #tpu.memory_space<vmem>>, %arg10: memref<1x128xf32, #tpu.memory_space<vmem>>, %arg11: memref<32x8xf32, #tpu.memory_space<vmem>>, %arg12: memref<32x2xf32, #tpu.memory_space<vmem>>, %arg13: memref<32x1xf32, #tpu.memory_space<vmem>>, %arg14: memref<1x32x128xf32, #tpu.memory_space<vmem>>) attributes {dimension_semantics = [#tpu.dimension_semantics<arbitrary>, #tpu.dimension_semantics<arbitrary>], iteration_bounds = array<i64: 2, 1>, scalar_prefetch = 0 : i64, scratch_operands = 4 : i64, tpu.core_type = #tpu.core_type<tc>, window_params = [{transform_indices = @transform_0, window_bounds = array<i64: 128, 32>}, {transform_indices = @transform_1, window_bounds = array<i64: 1, 128>}, {pipeline_mode = #tpu.pipeline_mode<synchronous>, transform_indices = @transform_2, window_bounds = array<i64: 8, 32>}, {pipeline_mode = #tpu.pipeline_mode<synchronous>, transform_indices = @transform_3, window_bounds = array<i64: 32, 32>}, {pipeline_mode = #tpu.pipeline_mode<synchronous>, transform_indices = @transform_4, window_bounds = array<i64: 32, 32>}, {pipeline_mode = #tpu.pipeline_mode<synchronous>, transform_indices = @transform_5, window_bounds = array<i64: 32, 3>}, {pipeline_mode = #tpu.pipeline_mode<synchronous>, transform_indices = @transform_6, window_bounds = array<i64: 32, 1>}, {pipeline_mode = #tpu.pipeline_mode<synchronous>, transform_indices = @transform_7, window_bounds = array<i64: 1, 1>}, {transform_indices = @transform_8, window_bounds = array<i64: 1, 128>}]} {
    %c0_i32 = arith.constant 0 : i32
    %0 = arith.cmpi eq, %arg0, %c0_i32 : i32
    %1 = arith.extui %0 : i1 to i32
    %c0_i32_0 = arith.constant 0 : i32
    %2 = arith.cmpi ne, %1, %c0_i32_0 : i32
    scf.if %2 {
      %c0_i32_2 = arith.constant 0 : i32
      %6 = arith.cmpi eq, %arg1, %c0_i32_2 : i32
      %7 = arith.extui %6 : i1 to i32
      %c0_i32_3 = arith.constant 0 : i32
      %8 = arith.cmpi ne, %7, %c0_i32_3 : i32
      scf.if %8 {
        %cst_30 = arith.constant 0.000000e+00 : f32
        %55 = vector.broadcast %cst_30 : f32 to vector<32x2xf32>
        %c0_31 = arith.constant 0 : index
        %c0_32 = arith.constant 0 : index
        %56 = vector.load %arg12[%c0_31, %c0_32] : memref<32x2xf32, #tpu.memory_space<vmem>>, vector<32x2xf32>
        tpu.vector_store %arg12[%c0_31, %c0_32], %55 {strides = array<i32>} : memref<32x2xf32, #tpu.memory_space<vmem>>, vector<32x2xf32>,
        %c0_33 = arith.constant 0 : index
        %c0_34 = arith.constant 0 : index
        %57 = vector.load %arg6[%c0_33, %c0_34] : memref<32x32xf32, #tpu.memory_space<vmem>>, vector<32x32xf32>
        %c0_35 = arith.constant 0 : index
        %c0_36 = arith.constant 0 : index
        %58 = vector.load %arg4[%c0_35, %c0_36] : memref<8x32xf32, #tpu.memory_space<vmem>>, vector<8x32xf32>
        %cst_37 = arith.constant dense<0.000000e+00> : vector<32x8xf32>
        %59 = tpu.matmul %57, %58, %cst_37 {dimension_numbers = #tpu.dot_dimension_numbers<[1], [1], [0], [0], [0, 0, 1, 0], [], []>} : vector<32x32xf32>, vector<8x32xf32>, vector<32x8xf32> -> vector<32x8xf32>
        %c0_38 = arith.constant 0 : index
        %c0_39 = arith.constant 0 : index
        %60 = vector.load %arg7[%c0_38, %c0_39] : memref<32x3xf32, #tpu.memory_space<vmem>>, vector<32x1xf32>
        %61 = vector.broadcast %60 : vector<32x1xf32> to vector<32x8xf32>
        %62 = arith.addf %59, %61 : vector<32x8xf32>
        %c0_40 = arith.constant 0 : index
        %c0_41 = arith.constant 0 : index
        %63 = vector.load %arg11[%c0_40, %c0_41] : memref<32x8xf32, #tpu.memory_space<vmem>>, vector<32x8xf32>
        tpu.vector_store %arg11[%c0_40, %c0_41], %62 {strides = array<i32>} : memref<32x8xf32, #tpu.memory_space<vmem>>, vector<32x8xf32>,
      } else {
      }
      %9 = tpu.iota {dimensions = array<i32: 0>} : vector<8x128xi32>
      %c0 = arith.constant 0 : index
      %c0_4 = arith.constant 0 : index
      %10 = vector.load %arg3[%c0, %c0_4] : memref<1x128xi32, #tpu.memory_space<vmem>>, vector<1x128xi32>
      %11 = vector.broadcast %10 : vector<1x128xi32> to vector<8x128xi32>
      %12 = arith.cmpi eq, %9, %11 : vector<8x128xi32>
      %13 = arith.extui %12 : vector<8x128xi1> to vector<8x128xi32>
      %14 = arith.sitofp %13 : vector<8x128xi32> to vector<8x128xf32>
      %c0_5 = arith.constant 0 : index
      %c0_6 = arith.constant 0 : index
      %15 = vector.load %arg5[%c0_5, %c0_6] : memref<32x32xf32, #tpu.memory_space<vmem>>, vector<32x32xf32>
      %c0_7 = arith.constant 0 : index
      %c0_8 = arith.constant 0 : index
      %16 = vector.load %arg2[%c0_7, %c0_8] : memref<128x32xf32, #tpu.memory_space<vmem>>, vector<128x32xf32>
      %cst = arith.constant dense<0.000000e+00> : vector<32x128xf32>
      %17 = tpu.matmul %15, %16, %cst {dimension_numbers = #tpu.dot_dimension_numbers<[1], [1], [0], [0], [0, 0, 1, 0], [], []>} : vector<32x32xf32>, vector<128x32xf32>, vector<32x128xf32> -> vector<32x128xf32>
      %c0_9 = arith.constant 0 : index
      %c0_10 = arith.constant 0 : index
      %18 = vector.load %arg11[%c0_9, %c0_10] : memref<32x8xf32, #tpu.memory_space<vmem>>, vector<32x8xf32>
      %cst_11 = arith.constant dense<0.000000e+00> : vector<32x128xf32>
      %19 = tpu.matmul %18, %14, %cst_11 {dimension_numbers = #tpu.dot_dimension_numbers<[1], [0], [0], [1], [0, 0, 1, 1], [], []>} : vector<32x8xf32>, vector<8x128xf32>, vector<32x128xf32> -> vector<32x128xf32>
      %20 = arith.addf %17, %19 : vector<32x128xf32>
      %21 = tpu.iota {dimensions = array<i32: 1>} : vector<1x128xi32>
      %c128_i32 = arith.constant 128 : i32
      %22 = arith.muli %arg1, %c128_i32 : i32
      %23 = vector.broadcast %22 : i32 to vector<1x128xi32>
      %24 = arith.addi %21, %23 : vector<1x128xi32>
      %c16_i32 = arith.constant 16 : i32
      %25 = vector.broadcast %c16_i32 : i32 to vector<1x128xi32>
      %26 = arith.cmpi slt, %24, %25 : vector<1x128xi32>
      %c0_i32_12 = arith.constant 0 : i32
      %27 = arith.cmpi eq, %arg1, %c0_i32_12 : i32
      %28 = arith.extui %27 : i1 to i32
      %c0_i32_13 = arith.constant 0 : i32
      %29 = arith.cmpi ne, %28, %c0_i32_13 : i32
      scf.if %29 {
        %cst_30 = arith.constant 0.000000e+00 : f32
        %55 = vector.shape_cast %26 : vector<1x128xi1> to vector<1x128xi1>
        %56 = vector.broadcast %55 : vector<1x128xi1> to vector<32x128xi1>
        %57 = vector.broadcast %cst_30 : f32 to vector<32x128xf32>
        %58 = arith.select %56, %20, %57 : vector<32x128xi1>, vector<32x128xf32>
        %cst_31 = arith.constant dense<0.000000e+00> : vector<32xf32>
        %59 = vector.multi_reduction <add>, %58, %cst_31 [1] : vector<32x128xf32> to vector<32xf32>
        %60 = vector.shape_cast %59 : vector<32xf32> to vector<32x1xf32>
        %cst_32 = arith.constant 6.250000e-02 : f32
        %61 = vector.broadcast %cst_32 : f32 to vector<32x1xf32>
        %62 = arith.mulf %60, %61 : vector<32x1xf32>
        %c0_33 = arith.constant 0 : index
        %c0_34 = arith.constant 0 : index
        %63 = vector.load %arg13[%c0_33, %c0_34] : memref<32x1xf32, #tpu.memory_space<vmem>>, vector<32x1xf32>
        tpu.vector_store %arg13[%c0_33, %c0_34], %62 {strides = array<i32>} : memref<32x1xf32, #tpu.memory_space<vmem>>, vector<32x1xf32>,
      } else {
      }
      %c0_14 = arith.constant 0 : index
      %c0_15 = arith.constant 0 : index
      %30 = vector.load %arg13[%c0_14, %c0_15] : memref<32x1xf32, #tpu.memory_space<vmem>>, vector<32x1xf32>
      %31 = vector.broadcast %30 : vector<32x1xf32> to vector<32x128xf32>
      %32 = arith.subf %20, %31 : vector<32x128xf32>
      %cst_16 = arith.constant 0.000000e+00 : f32
      %33 = vector.shape_cast %26 : vector<1x128xi1> to vector<1x128xi1>
      %34 = vector.broadcast %33 : vector<1x128xi1> to vector<32x128xi1>
      %35 = vector.broadcast %cst_16 : f32 to vector<32x128xf32>
      %36 = arith.select %34, %32, %35 : vector<32x128xi1>, vector<32x128xf32>
      %c0_17 = arith.constant 0 : index
      %c0_18 = arith.constant 0 : index
      %37 = vector.load %arg12[%c0_17, %c0_18] : memref<32x2xf32, #tpu.memory_space<vmem>>, vector<32x1xf32>
      %cst_19 = arith.constant dense<0.000000e+00> : vector<32xf32>
      %38 = vector.multi_reduction <add>, %36, %cst_19 [1] : vector<32x128xf32> to vector<32xf32>
      %39 = vector.shape_cast %38 : vector<32xf32> to vector<32x1xf32>
      %40 = arith.addf %37, %39 : vector<32x1xf32>
      %c0_20 = arith.constant 0 : index
      %c0_21 = arith.constant 0 : index
      %41 = vector.load %arg12[%c0_20, %c0_21] : memref<32x2xf32, #tpu.memory_space<vmem>>, vector<32x1xf32>
      tpu.vector_store %arg12[%c0_20, %c0_21], %40 {strides = array<i32>} : memref<32x2xf32, #tpu.memory_space<vmem>>, vector<32x1xf32>,
      %c0_22 = arith.constant 0 : index
      %c1 = arith.constant 1 : index
      %42 = vector.load %arg12[%c0_22, %c1] : memref<32x2xf32, #tpu.memory_space<vmem>>, vector<32x1xf32>
      %43 = arith.mulf %36, %36 : vector<32x128xf32>
      %cst_23 = arith.constant dense<0.000000e+00> : vector<32xf32>
      %44 = vector.multi_reduction <add>, %43, %cst_23 [1] : vector<32x128xf32> to vector<32xf32>
      %45 = vector.shape_cast %44 : vector<32xf32> to vector<32x1xf32>
      %46 = arith.addf %42, %45 : vector<32x1xf32>
      %c0_24 = arith.constant 0 : index
      %c1_25 = arith.constant 1 : index
      %47 = vector.load %arg12[%c0_24, %c1_25] : memref<32x2xf32, #tpu.memory_space<vmem>>, vector<32x1xf32>
      tpu.vector_store %arg12[%c0_24, %c1_25], %46 {strides = array<i32>} : memref<32x2xf32, #tpu.memory_space<vmem>>, vector<32x1xf32>,
      %48 = arith.index_cast %arg1 : i32 to index
      %c0_26 = arith.constant 0 : index
      %c0_27 = arith.constant 0 : index
      %49 = vector.load %arg14[%48, %c0_26, %c0_27] : memref<1x32x128xf32, #tpu.memory_space<vmem>>, vector<1x32x128xf32>
      %50 = vector.shape_cast %49 : vector<1x32x128xf32> to vector<32x128xf32>
      %51 = vector.shape_cast %20 : vector<32x128xf32> to vector<1x32x128xf32>
      tpu.vector_store %arg14[%48, %c0_26, %c0_27], %51 {strides = array<i32>} : memref<1x32x128xf32, #tpu.memory_space<vmem>>, vector<1x32x128xf32>,
      %c0_i32_28 = arith.constant 0 : i32
      %52 = arith.cmpi eq, %arg1, %c0_i32_28 : i32
      %53 = arith.extui %52 : i1 to i32
      %c0_i32_29 = arith.constant 0 : i32
      %54 = arith.cmpi ne, %53, %c0_i32_29 : i32
      scf.if %54 {
        %c0_30 = arith.constant 0 : index
        %c0_31 = arith.constant 0 : index
        %55 = vector.load %arg12[%c0_30, %c0_31] : memref<32x2xf32, #tpu.memory_space<vmem>>, vector<32x1xf32>
        %cst_32 = arith.constant 6.250000e-02 : f32
        %56 = vector.broadcast %cst_32 : f32 to vector<32x1xf32>
        %57 = arith.mulf %55, %56 : vector<32x1xf32>
        %c0_33 = arith.constant 0 : index
        %c1_34 = arith.constant 1 : index
        %58 = vector.load %arg12[%c0_33, %c1_34] : memref<32x2xf32, #tpu.memory_space<vmem>>, vector<32x1xf32>
        %cst_35 = arith.constant 6.250000e-02 : f32
        %59 = vector.broadcast %cst_35 : f32 to vector<32x1xf32>
        %60 = arith.mulf %58, %59 : vector<32x1xf32>
        %61 = arith.mulf %57, %57 : vector<32x1xf32>
        %62 = arith.subf %60, %61 : vector<32x1xf32>
        %cst_36 = arith.constant 0.000000e+00 : f32
        %63 = vector.broadcast %cst_36 : f32 to vector<32x1xf32>
        %64 = arith.maximumf %62, %63 : vector<32x1xf32>
        %c0_37 = arith.constant 0 : index
        %c0_38 = arith.constant 0 : index
        %65 = vector.load %arg13[%c0_37, %c0_38] : memref<32x1xf32, #tpu.memory_space<vmem>>, vector<32x1xf32>
        %66 = arith.addf %65, %57 : vector<32x1xf32>
        %c0_39 = arith.constant 0 : index
        %c1_40 = arith.constant 1 : index
        %67 = vector.load %arg7[%c0_39, %c1_40] : memref<32x3xf32, #tpu.memory_space<vmem>>, vector<32x1xf32>
        %cst_41 = arith.constant 9.99999974E-6 : f32
        %68 = vector.broadcast %cst_41 : f32 to vector<32x1xf32>
        %69 = arith.addf %64, %68 : vector<32x1xf32>
        %70 = math.rsqrt %69 : vector<32x1xf32>
        %71 = arith.mulf %67, %70 : vector<32x1xf32>
        %c0_42 = arith.constant 0 : index
        %c0_43 = arith.constant 0 : index
        %72 = vector.load %arg12[%c0_42, %c0_43] : memref<32x2xf32, #tpu.memory_space<vmem>>, vector<32x1xf32>
        tpu.vector_store %arg12[%c0_42, %c0_43], %71 {strides = array<i32>} : memref<32x2xf32, #tpu.memory_space<vmem>>, vector<32x1xf32>,
        %c0_44 = arith.constant 0 : index
        %c2 = arith.constant 2 : index
        %73 = vector.load %arg7[%c0_44, %c2] : memref<32x3xf32, #tpu.memory_space<vmem>>, vector<32x1xf32>
        %74 = arith.mulf %66, %71 : vector<32x1xf32>
        %75 = arith.subf %73, %74 : vector<32x1xf32>
        %c0_45 = arith.constant 0 : index
        %c1_46 = arith.constant 1 : index
        %76 = vector.load %arg12[%c0_45, %c1_46] : memref<32x2xf32, #tpu.memory_space<vmem>>, vector<32x1xf32>
        tpu.vector_store %arg12[%c0_45, %c1_46], %75 {strides = array<i32>} : memref<32x2xf32, #tpu.memory_space<vmem>>, vector<32x1xf32>,
      } else {
      }
    } else {
    }
    %c1_i32 = arith.constant 1 : i32
    %3 = arith.cmpi eq, %arg0, %c1_i32 : i32
    %4 = arith.extui %3 : i1 to i32
    %c0_i32_1 = arith.constant 0 : i32
    %5 = arith.cmpi ne, %4, %c0_i32_1 : i32
    scf.if %5 {
      %c0 = arith.constant 0 : index
      %c0_2 = arith.constant 0 : index
      %6 = vector.load %arg12[%c0, %c0_2] : memref<32x2xf32, #tpu.memory_space<vmem>>, vector<32x1xf32>
      %c0_3 = arith.constant 0 : index
      %c1 = arith.constant 1 : index
      %7 = vector.load %arg12[%c0_3, %c1] : memref<32x2xf32, #tpu.memory_space<vmem>>, vector<32x1xf32>
      %8 = arith.index_cast %arg1 : i32 to index
      %c0_4 = arith.constant 0 : index
      %c0_5 = arith.constant 0 : index
      %9 = vector.load %arg14[%8, %c0_4, %c0_5] : memref<1x32x128xf32, #tpu.memory_space<vmem>>, vector<1x32x128xf32>
      %10 = vector.shape_cast %9 : vector<1x32x128xf32> to vector<32x128xf32>
      %11 = vector.broadcast %6 : vector<32x1xf32> to vector<32x128xf32>
      %12 = arith.mulf %10, %11 : vector<32x128xf32>
      %13 = vector.broadcast %7 : vector<32x1xf32> to vector<32x128xf32>
      %14 = arith.addf %12, %13 : vector<32x128xf32>
      %cst = arith.constant 0.000000e+00 : f32
      %15 = vector.broadcast %cst : f32 to vector<32x128xf32>
      %16 = arith.maximumf %14, %15 : vector<32x128xf32>
      %c0_6 = arith.constant 0 : index
      %c0_7 = arith.constant 0 : index
      %17 = vector.load %arg8[%c0_6, %c0_7] : memref<32x1xf32, #tpu.memory_space<vmem>>, vector<32x1xf32>
      %18 = vector.broadcast %17 : vector<32x1xf32> to vector<32x128xf32>
      %19 = arith.mulf %16, %18 : vector<32x128xf32>
      %cst_8 = arith.constant dense<0.000000e+00> : vector<128xf32>
      %20 = vector.multi_reduction <add>, %19, %cst_8 [0] : vector<32x128xf32> to vector<128xf32>
      %21 = vector.shape_cast %20 : vector<128xf32> to vector<1x128xf32>
      %c0_9 = arith.constant 0 : index
      %c0_10 = arith.constant 0 : index
      %22 = vector.load %arg9[%c0_9, %c0_10] : memref<1x1xf32, #tpu.memory_space<vmem>>, vector<1x1xf32>
      %23 = vector.broadcast %22 : vector<1x1xf32> to vector<1x128xf32>
      %24 = arith.addf %21, %23 : vector<1x128xf32>
      %c0_11 = arith.constant 0 : index
      %c0_12 = arith.constant 0 : index
      %25 = vector.load %arg10[%c0_11, %c0_12] : memref<1x128xf32, #tpu.memory_space<vmem>>, vector<1x128xf32>
      tpu.vector_store %arg10[%c0_11, %c0_12], %24 {strides = array<i32>} : memref<1x128xf32, #tpu.memory_space<vmem>>, vector<1x128xf32>,
    } else {
    }
    return
  }
  func.func @transform_0(%arg0: i32, %arg1: i32) -> (i32, i32) {
    %c1_i32 = arith.constant 1 : i32
    %0 = arith.subi %c1_i32, %arg0 : i32
    %1 = arith.muli %0, %arg1 : i32
    %c0_i32 = arith.constant 0 : i32
    %c0_i32_0 = arith.constant 0 : i32
    return %1, %c0_i32 : i32, i32
  }
  func.func @transform_1(%arg0: i32, %arg1: i32) -> (i32, i32) {
    %c1_i32 = arith.constant 1 : i32
    %0 = arith.subi %c1_i32, %arg0 : i32
    %1 = arith.muli %0, %arg1 : i32
    %c0_i32 = arith.constant 0 : i32
    %c0_i32_0 = arith.constant 0 : i32
    return %c0_i32, %1 : i32, i32
  }
  func.func @transform_2(%arg0: i32, %arg1: i32) -> (i32, i32) {
    %c0_i32 = arith.constant 0 : i32
    %c0_i32_0 = arith.constant 0 : i32
    %c0_i32_1 = arith.constant 0 : i32
    return %c0_i32, %c0_i32_0 : i32, i32
  }
  func.func @transform_3(%arg0: i32, %arg1: i32) -> (i32, i32) {
    %c0_i32 = arith.constant 0 : i32
    %c0_i32_0 = arith.constant 0 : i32
    %c0_i32_1 = arith.constant 0 : i32
    return %c0_i32, %c0_i32_0 : i32, i32
  }
  func.func @transform_4(%arg0: i32, %arg1: i32) -> (i32, i32) {
    %c0_i32 = arith.constant 0 : i32
    %c0_i32_0 = arith.constant 0 : i32
    %c0_i32_1 = arith.constant 0 : i32
    return %c0_i32, %c0_i32_0 : i32, i32
  }
  func.func @transform_5(%arg0: i32, %arg1: i32) -> (i32, i32) {
    %c0_i32 = arith.constant 0 : i32
    %c0_i32_0 = arith.constant 0 : i32
    %c0_i32_1 = arith.constant 0 : i32
    return %c0_i32, %c0_i32_0 : i32, i32
  }
  func.func @transform_6(%arg0: i32, %arg1: i32) -> (i32, i32) {
    %c0_i32 = arith.constant 0 : i32
    %c0_i32_0 = arith.constant 0 : i32
    %c0_i32_1 = arith.constant 0 : i32
    return %c0_i32, %c0_i32_0 : i32, i32
  }
  func.func @transform_7(%arg0: i32, %arg1: i32) -> (i32, i32) {
    %c0_i32 = arith.constant 0 : i32
    %c0_i32_0 = arith.constant 0 : i32
    %c0_i32_1 = arith.constant 0 : i32
    return %c0_i32, %c0_i32_0 : i32, i32
  }
  func.func @transform_8(%arg0: i32, %arg1: i32) -> (i32, i32) {
    %0 = arith.muli %arg0, %arg1 : i32
    %c0_i32 = arith.constant 0 : i32
    %c0_i32_0 = arith.constant 0 : i32
    return %c0_i32, %0 : i32, i32
  }
}

</mosaic_0001>

<bundles_post_ra>
// kernel: qnet_head.1
= control target key start
LH: loop header
LB: loop body
LE: loop exit
PB: predicated region body
PF: predicated region fallthrough
CT: control target
= control target key end

     0   :  { %s1544_s29 = smov 0   ;;  %s1546_s30 = smov 0   ;;  %s1819_s0 = inlined_call_operand.vmem [shape: f32[16,32], index: 0, kind: input, shape index: {}]   ;;  %s1820_s1 = inlined_call_operand.vmem [shape: s32[1,16], index: 1, kind: input, shape index: {}]   ;;  %s1821_s2 = inlined_call_operand.vmem [shape: f32[8,32], index: 2, kind: input, shape index: {}]   ;;  %s1822_s3 = inlined_call_operand.vmem [shape: f32[32,32], index: 3, kind: input, shape index: {}]   ;;  %s1823_s4 = inlined_call_operand.vmem [shape: f32[32,32], index: 4, kind: input, shape index: {}]   ;;  %s1824_s5 = inlined_call_operand.vmem [shape: f32[32,3], index: 5, kind: input, shape index: {}]   ;;  %s1825_s6 = inlined_call_operand.vmem [shape: f32[32,1], index: 6, kind: input, shape index: {}]   ;;  %s1826_s7 = inlined_call_operand.<no memory space> [shape: f32[1,1], index: 7, kind: input, shape index: {}]   ;;  %s1827_s8 = inlined_call_operand.vmem [shape: f32[1,128], index: 8, kind: output, shape index: {}]  }
   0x1   :  { %v13_v0 = vstv %s1826_s7  ;;  %s1548_s9 = smov 0  }
   0x2   :  { %14 = vst [vmem:[#allocation6] sm:$0x1] %v13_v0 }
   0x3 LB: > { %s32_s7 = sadd.s32 1, %s1482_s30  ;;  %p1239_p0 = scmp.ge.s32.totalorder %s1486_s9, 1  ;;  %s1486_s9 = sphi %s1548_s9, %s20_s9   ;;  %s1482_s30 = sphi %s1546_s30, %s1831_s30   ;;  %s1478_s29 = sphi %s1544_s29, %s1830_s29  }
   0x4   : > { %p34_p1 = scmp.ge.s32.totalorder %s32_s7, 2  ;;  %p307_p2 = scmp.lt.s32.totalorder %s1486_s9, 3 }
   0x6   : > { %s1833_s7 = smov (%p34_p1, %s32_s7), 0  ;;  %p308_p3 = pnand %p1239_p0, %p307_p2 }
   0x7   : > { %p1240_p4 = scmp.ne.s32.totalorder (!%p308_p3), %s1478_s29, 0 }
   0x8   : > { %311 = sbr.rel (%p308_p3) target bundleno = 1579 (0x62b), region = 52 }
   0xf   : > { %378 = sbr.rel (%p1240_p4) target bundleno = 1401 (0x579), region = 56  ;;  %v392_v1 = vld [vmem:[%s1821_s2] sm:$0xff] (!%p1240_p4)  ;;  %vm417_vm0 = vcmask (!%p1240_p4), 261120   ;;  %v389_v3 = vld [vmem:[%s1823_s4 + $0x8] sm:$0xff] (!%p1240_p4)  ;;  %v1488_v5 = vmov (!%p1240_p4), 0   ;;  %v1591_v7 = vld [vmem:[%s1824_s5 + $0x10] sm:$0xff] (!%p1240_p4)  ;;  %v523_v36 = vlaneseq (!%p1240_p4) }
  0x10   : > { %v388_v2 = vld [vmem:[%s1823_s4] sm:$0xff] (!%p1240_p4)  ;;  %1308 = vmatprep.subr.msk.mxu0 (!%p1240_p4), %vm417_vm0, %v392_v1  ;;  %vm1578_vm1 = vmpackc.low (!%p1240_p4), %vm417_vm0, %vm417_vm0  ;;  %1446 = vset.pattern.permute.xlu0 (!%p1240_p4), %v1488_v5  ;;  %v390_v8 = vld [vmem:[%s1823_s4 + $0x10] sm:$0xff] (!%p1240_p4)  ;;  %v1489_v40 = vmov (!%p1240_p4), 1.0   ;;  %vm518_vm3 = vcmask (!%p1240_p4), 64512   ;;  %vm828_vm5 = vcmask (!%p1240_p4), 7168   ;;  %vm383_vm6 = vcmask (!%p1240_p4), 15360  }
  0x11   : > { %1310 = vmatprep.mubr.msk.f32.mxu0 (!%p1240_p4), %vm417_vm0, %v388_v2  ;;  %1309 = vmatpush3.xpose.msk.msra.mxu0 (!%p1240_p4), %vm417_vm0, %v392_v1  ;;  %v1586_v6 = vld [vmem:[%s1824_s5] sm:$0xff] (!%p1240_p4)  ;;  %v538_v10 = vld [vmem:[%s1819_s0 + $0x8] sm:$0xff] (!%p1240_p4)  ;;  %v539_v13 = vld [vmem:[%s1819_s0 + $0x10] sm:$0xff] (!%p1240_p4)  ;;  %v524_v38 = vshrl.u32 (!%p1240_p4), %v523_v36, 7  ;;  %v1723_v0 = vand.u32 (!%p1240_p4), 127, %v523_v36  ;;  %vm908_vm7 = vcmask (!%p1240_p4), 15368  }
  0x12   : > { %399 = vperm.xlu0 (!%p1240_p4), %1446, %v1586_v6   ;;  %1447 = vset.pattern.permute.xlu1 (!%p1240_p4), %v1488_v5  ;;  %v537_v9 = vld [vmem:[%s1819_s0] sm:$0xff] (!%p1240_p4)  ;;  %v1607_v11 = vld [vmem:[%s1824_s5 + $0x8] sm:$0xff] (!%p1240_p4)  ;;  %v540_v14 = vld [vmem:[%s1819_s0 + $0x18] sm:$0xff] (!%p1240_p4)  ;;  %s1491_s13 = smov (!%p1240_p4), 1   ;;  %s1492_s14 = smov (!%p1240_p4), 127  }
  0x13   : > { %409 = vperm.xlu1 (!%p1240_p4), %1447, %v1591_v7   ;;  %v1362_v12 = vpack.c.bf16 (!%p1240_p4), %v538_v10, %v537_v9  ;;  %v1619_v15 = vld [vmem:[%s1824_s5 + $0x18] sm:$0xff] (!%p1240_p4)  ;;  %v1368_v16 = vpack.c.bf16 (!%p1240_p4), %v540_v14, %v539_v13  ;;  %v541_v18 = vld [vmem:[%s1819_s0 + $0x20] sm:$0xff] (!%p1240_p4)  ;;  %v542_v19 = vld [vmem:[%s1819_s0 + $0x28] sm:$0xff] (!%p1240_p4)  ;;  %vm806_vm4 = vcmp.lt.s32.totalorder (!%p1240_p4), %v1723_v0, 16  ;;  %s1493_s15 = smov (!%p1240_p4), 2  }
  0x14   : > { %1311 = vmatmul.mubr.msk.f32.vlgmr.msra.gmra.mrb[0].mxu0 (!%p1240_p4), %vm417_vm0, %v389_v3  ;;  %v391_v17 = vld [vmem:[%s1823_s4 + $0x18] sm:$0xff] (!%p1240_p4)  ;;  %v1374_v20 = vpack.c.bf16 (!%p1240_p4), %v542_v19, %v541_v18  ;;  %v543_v21 = vld [vmem:[%s1819_s0 + $0x30] sm:$0xff] (!%p1240_p4)  ;;  %v545_v24 = vld [vmem:[%s1819_s0 + $0x40] sm:$0xff] (!%p1240_p4) }
  0x15   : > { %1313 = vmatprep.mubr.msk.f32.mxu0 (!%p1240_p4), %vm417_vm0, %v390_v8  ;;  %1364 = vmatprep.subr.msk.bf16.mxu1 (!%p1240_p4), %vm1578_vm1, %v1362_v12  ;;  %v544_v22 = vld [vmem:[%s1819_s0 + $0x38] sm:$0xff] (!%p1240_p4)  ;;  %v546_v25 = vld [vmem:[%s1819_s0 + $0x48] sm:$0xff] (!%p1240_p4)  ;;  %v547_v27 = vld [vmem:[%s1819_s0 + $0x50] sm:$0xff] (!%p1240_p4) }
  0x16   : > { %404 = vperm.xlu0 %1446, %v1607_v11   ;;  %1367 = vmatpush3.bf16.xpose.msk.msra.mxu1 %vm1578_vm1, %v1362_v12  ;;  %v1380_v23 = vpack.c.bf16 %v544_v22, %v543_v21  ;;  %v1386_v26 = vpack.c.bf16 %v546_v25, %v545_v24  ;;  %v548_v28 = vld [vmem:[%s1819_s0 + $0x58] sm:$0xff]  ;;  %v549_v30 = vld [vmem:[%s1819_s0 + $0x60] sm:$0xff]  ;;  %v550_v31 = vld [vmem:[%s1819_s0 + $0x68] sm:$0xff] }
  0x17   : > { %414 = vperm.xlu1 %1447, %v1619_v15   ;;  %1370 = vmatprep.subr.msk.bf16.mxu1 %vm1578_vm1, %v1368_v16  ;;  %v1392_v29 = vpack.c.bf16 %v548_v28, %v547_v27  ;;  %v1398_v32 = vpack.c.bf16 %v550_v31, %v549_v30  ;;  %v551_v33 = vld [vmem:[%s1819_s0 + $0x70] sm:$0xff]  ;;  %v552_v34 = vld [vmem:[%s1819_s0 + $0x78] sm:$0xff]  ;;  %v1246_v37 = vld [vmem:[%s1820_s1] ss:$0 sm:$0xff] }
  0x18   : > { %1314 = vmatmul.mubr.msk.f32.gmra.mrb[2].mxu0 %vm417_vm0, %v391_v17  ;;  %v1404_v35 = vpack.c.bf16 %v552_v34, %v551_v33  ;;  %v533_v39 = vld [vmem:[%s1822_s3] sm:$0xff]  ;;  %vm530_vm2 = vcmp.eq.s32.totalorder %v524_v38, %v1246_v37  ;;  %v534_v41 = vld [vmem:[%s1822_s3 + $0x8] sm:$0xff]  ;;  %v535_v42 = vld [vmem:[%s1822_s3 + $0x10] sm:$0xff] }
  0x19   : > { %1356 = vmatprep.mubr.msk.f32.mxu1 %vm417_vm0, %v533_v39  ;;  %1316 = vmatprep.subr.msk.mxu0 %vm530_vm2, %v1489_v40  ;;  %v536_v43 = vld [vmem:[%s1822_s3 + $0x18] sm:$0xff] }
  0x1a   : > { %1317 = vmatpush3.msk.msra.mxu0 %vm530_vm2, %v1489_v40 }
  0x1e   : > { %1373 = vmatpush3.bf16.xpose.msk.msra.mxu1 %vm1578_vm1, %v1368_v16 }
  0x1f   : > { %1376 = vmatprep.subr.msk.bf16.mxu1 %vm1578_vm1, %v1374_v20 }
  0x26   : > { %1379 = vmatpush3.bf16.xpose.msk.msra.mxu1 %vm1578_vm1, %v1374_v20 }
  0x27   : > { %1382 = vmatprep.subr.msk.bf16.mxu1 %vm1578_vm1, %v1380_v23 }
  0x2e   : > { %1385 = vmatpush3.bf16.xpose.msk.msra.mxu1 %vm1578_vm1, %v1380_v23 }
  0x2f   : > { %1388 = vmatprep.subr.msk.bf16.mxu1 %vm1578_vm1, %v1386_v26 }
  0x36   : > { %1391 = vmatpush3.bf16.xpose.msk.msra.mxu1 %vm1578_vm1, %v1386_v26 }
  0x37   : > { %1394 = vmatprep.subr.msk.bf16.mxu1 %vm1578_vm1, %v1392_v29 }
  0x3e   : > { %1397 = vmatpush3.bf16.xpose.msk.msra.mxu1 %vm1578_vm1, %v1392_v29 }
  0x3f   : > { %1400 = vmatprep.subr.msk.bf16.mxu1 %vm1578_vm1, %v1398_v32 }
  0x46   : > { %1403 = vmatpush3.bf16.xpose.msk.msra.mxu1 %vm1578_vm1, %v1398_v32 }
  0x47   : > { %1406 = vmatprep.subr.msk.bf16.mxu1 %vm1578_vm1, %v1404_v35 }
  0x4e   : > { %1409 = vmatpush3.bf16.xpose.msk.msra.mxu1 %vm1578_vm1, %v1404_v35 }
  0x55   : > { %1357 = vmatmul.mubr.msk.f32.vlgmr.msra.gmra.mrb[0].mxu1 %vm417_vm0, %v534_v41 }
  0x56   : > { %1359 = vmatprep.mubr.msk.f32.mxu1 %vm417_vm0, %v535_v42  ;;  %v1490_v42 = vmov 0.0  }
  0x57   : > { %385 = vst.msk [vmem:[#allocation3 + $0x8] sm:$0xff] %vm383_vm6, %v1490_v42  ;;  %384 = vst.msk [vmem:[#allocation3] sm:$0xff] %vm383_vm6, %v1490_v42 }
  0x58   : > { %386 = vst.msk [vmem:[#allocation3 + $0x10] sm:$0xff] %vm383_vm6, %v1490_v42  ;;  %387 = vst.msk [vmem:[#allocation3 + $0x18] sm:$0xff] %vm383_vm6, %v1490_v42 }
  0x59   : > { %1360 = vmatmul.mubr.msk.f32.gmra.mrb[2].mxu1 %vm417_vm0, %v536_v43 }
  0x91   : > { %v400_v44 = vpop.permute.xlu0 %399 }
  0x92   : > { %v410_v45 = vpop.permute.xlu1 %409 }
  0x95   : > { %v405_v46 = vpop.permute.xlu0 %404 }
  0x96   : > { %v415_v51 = vpop.permute.xlu1 %414 }
  0xe7   : > { %v1312_v47 = vpop.f32.mrb[0].mxu0 }
  0xe8   : > { %v505_v48 = vadd.f32 %v1312_v47, %v405_v46  ;;  %v499_v49 = vpop.f32.mrb[1].mxu0  ;;  %v868_v46 = vld [vmem:[#allocation3 + $0x8] sm:$0xff]  ;;  %v867_v47 = vld [vmem:[#allocation3] sm:$0xff] }
  0xe9   : > { %v500_v50 = vadd.f32 %v499_v49, %v400_v44 }
  0xea   : > { %520 = vst.msk [vmem:[#allocation2 + $0x8] sm:$0xff] %vm518_vm3, %v505_v48 }
  0xeb   : > { %519 = vst.msk [vmem:[#allocation2] sm:$0xff] %vm518_vm3, %v500_v50  ;;  %v1315_v52 = vpop.f32.mrb[2].mxu0 }
  0xec   : > { %v515_v53 = vadd.f32 %v1315_v52, %v415_v51  ;;  %v509_v54 = vpop.f32.mrb[3].mxu0  ;;  %v869_v52 = vld [vmem:[#allocation3 + $0x10] sm:$0xff] }
  0xed   : > { %v510_v55 = vadd.f32 %v509_v54, %v410_v45 }
  0xee   : > { %522 = vst.msk [vmem:[#allocation2 + $0x18] sm:$0xff] %vm518_vm3, %v515_v53 }
  0xef   : > { %521 = vst.msk [vmem:[#allocation2 + $0x10] sm:$0xff] %vm518_vm3, %v510_v55  ;;  %v870_v55 = vld [vmem:[#allocation3 + $0x18] sm:$0xff] }
  0xf1   : > { %v554_v57 = vld [vmem:[#allocation2 + $0x8] sm:$0xff] }
  0xf2   : > { %v553_v56 = vld [vmem:[#allocation2] sm:$0xff] }
  0xf3   : > { %1318 = vmatprep.mubr.msk.f32.mxu0 %vm518_vm3, %v553_v56 }
  0xf4   : > { %1319 = vmatmul.mubr.msk.f32.vlgmr.msra.gmra.mrb[4].mxu0 %vm518_vm3, %v554_v57 }
  0xf5   : > { %v556_v59 = vld [vmem:[#allocation2 + $0x18] sm:$0xff] }
  0xf6   : > { %v555_v58 = vld [vmem:[#allocation2 + $0x10] sm:$0xff] }
  0xf7   : > { %1321 = vmatprep.mubr.msk.f32.mxu0 %vm518_vm3, %v555_v58 }
  0xf8   : > { %1322 = vmatmul.mubr.msk.f32.gmra.mrb[6].mxu0 %vm518_vm3, %v556_v59 }
 0x128   : > { %v1358_v60 = vpop.f32.mrb[0].mxu1 }
 0x129   : > { %v782_v61 = vpop.f32.mrb[1].mxu1 }
 0x12c   : > { %v1361_v62 = vpop.f32.mrb[2].mxu1 }
 0x12d   : > { %v792_v63 = vpop.f32.mrb[3].mxu1 }
 0x1c7   : > { %v1320_v1 = vpop.f32.mrb[4].mxu0 }
 0x1c8   : > { %v788_v2 = vadd.f32 %v1358_v60, %v1320_v1  ;;  %v636_v3 = vpop.f32.mrb[5].mxu0 }
 0x1c9   : > { %v783_v4 = vadd.f32 %v782_v61, %v636_v3 }
 0x1ca   : > { %916 = vst [vmem:[#allocation5 + $0x8] sm:$0xff] %v788_v2  ;;  %v813_v5 = vsel %vm806_vm4, %v788_v2, 0.0 }
 0x1cb   : > { %915 = vst [vmem:[#allocation5] sm:$0xff] %v783_v4  ;;  %818 = vadd.xlane.f32.xlu1 %v813_v5  ;;  %v1323_v8 = vpop.f32.mrb[6].mxu0  ;;  %v812_v9 = vsel %vm806_vm4, %v783_v4, 0.0 }
 0x1cc   : > { %v798_v10 = vadd.f32 %v1361_v62, %v1323_v8  ;;  %816 = vadd.xlane.f32.xlu0 %v812_v9  ;;  %v646_v12 = vpop.f32.mrb[7].mxu0 }
 0x1cd   : > { %v793_v13 = vadd.f32 %v792_v63, %v646_v12 }
 0x1ce   : > { %918 = vst [vmem:[#allocation5 + $0x18] sm:$0xff] %v798_v10  ;;  %v815_v16 = vsel %vm806_vm4, %v798_v10, 0.0 }
 0x1cf   : > { %917 = vst [vmem:[#allocation5 + $0x10] sm:$0xff] %v793_v13  ;;  %v814_v14 = vsel %vm806_vm4, %v793_v13, 0.0 }
 0x1d0   : > { %820 = vadd.xlane.f32.xlu0 %v814_v14 }
 0x1d4   : > { %822 = vadd.xlane.f32.xlu0 %v815_v16 }
 0x258   : > { %v819_v17 = vpop.xlane.xlu1 %818 }
 0x259   : > { %v825_v18 = vmul.f32 0.0625, %v819_v17  ;;  %v817_v19 = vpop.xlane.xlu0 %816 }
 0x25a   : > { %v824_v20 = vmul.f32 0.0625, %v817_v19 }
 0x25b   : > { %830 = vst.msk [vmem:[#allocation4 + $0x8] sm:$0xff] %vm828_vm5, %v825_v18 }
 0x25c   : > { %829 = vst.msk [vmem:[#allocation4] sm:$0xff] %vm828_vm5, %v824_v20 }
 0x25d   : > { %v821_v21 = vpop.xlane.xlu0 %820 }
 0x25e   : > { %v826_v22 = vmul.f32 0.0625, %v821_v21 }
 0x260   : > { %831 = vst.msk [vmem:[#allocation4 + $0x10] sm:$0xff] %vm828_vm5, %v826_v22 }
 0x261   : > { %v823_v23 = vpop.xlane.xlu0 %822 }
 0x262   : > { %v827_v24 = vmul.f32 0.0625, %v823_v23  ;;  %v1737_v25 = vld [vmem:[#allocation4 + $0x8] sm:$0xff] }
 0x263   : > { %844 = vperm.xlu0 %1446, %v1737_v25   ;;  %v1740_v26 = vld [vmem:[#allocation4] sm:$0xff] }
 0x264   : > { %832 = vst.msk [vmem:[#allocation4 + $0x18] sm:$0xff] %vm828_vm5, %v827_v24  ;;  %839 = vperm.xlu1 %1447, %v1740_v26  }
 0x267   : > { %v1744_v27 = vld [vmem:[#allocation4 + $0x10] sm:$0xff] }
 0x268   : > { %849 = vperm.xlu1 %1447, %v1744_v27  }
 0x26b   : > { %v1747_v28 = vld [vmem:[#allocation4 + $0x18] sm:$0xff] }
 0x26c   : > { %854 = vperm.xlu1 %1447, %v1747_v28  }
 0x2e2   : > { %v845_v29 = vpop.permute.xlu0 %844 }
 0x2e3   : > { %v858_v30 = vsub.f32 %v788_v2, %v845_v29  ;;  %v840_v31 = vpop.permute.xlu1 %839 }
 0x2e4   : > { %v857_v32 = vsub.f32 %v783_v4, %v840_v31 }
 0x2e5   : > { %v864_v33 = vsel %vm806_vm4, %v858_v30, 0.0 }
 0x2e6   : > { %873 = vadd.xlane.f32.xlu1 %v864_v33  ;;  %v863_v34 = vsel %vm806_vm4, %v857_v32, 0.0  ;;  %v893_v44 = vmul.f32 %v864_v33, %v864_v33 }
 0x2e7   : > { %871 = vadd.xlane.f32.xlu0 %v863_v34  ;;  %v850_v35 = vpop.permute.xlu1 %849  ;;  %v892_v36 = vmul.f32 %v863_v34, %v863_v34 }
 0x2e8   : > { %v859_v37 = vsub.f32 %v793_v13, %v850_v35 }
 0x2ea   : > { %896 = vadd.xlane.f32.xlu1 %v892_v36  ;;  %v865_v38 = vsel %vm806_vm4, %v859_v37, 0.0 }
 0x2eb   : > { %875 = vadd.xlane.f32.xlu0 %v865_v38  ;;  %v855_v39 = vpop.permute.xlu1 %854  ;;  %v894_v40 = vmul.f32 %v865_v38, %v865_v38 }
 0x2ec   : > { %v860_v41 = vsub.f32 %v798_v10, %v855_v39 }
 0x2ee   : > { %900 = vadd.xlane.f32.xlu1 %v894_v40  ;;  %v866_v43 = vsel %vm806_vm4, %v860_v41, 0.0 }
 0x2ef   : > { %877 = vadd.xlane.f32.xlu0 %v866_v43  ;;  %v895_v45 = vmul.f32 %v866_v43, %v866_v43 }
 0x2f3   : > { %898 = vadd.xlane.f32.xlu0 %v893_v44 }
 0x2f7   : > { %902 = vadd.xlane.f32.xlu0 %v895_v45 }
 0x373   : > { %v874_v48 = vpop.xlane.xlu1 %873 }
 0x374   : > { %v880_v49 = vadd.f32 %v874_v48, %v868_v46  ;;  %v872_v50 = vpop.xlane.xlu0 %871 }
 0x375   : > { %v879_v51 = vadd.f32 %v872_v50, %v867_v47 }
 0x376   : > { %885 = vst.msk [vmem:[#allocation3 + $0x8] sm:$0xff] %vm828_vm5, %v880_v49 }
 0x377   : > { %884 = vst.msk [vmem:[#allocation3] sm:$0xff] %vm828_vm5, %v879_v51  ;;  %v897_v56 = vpop.xlane.xlu1 %896 }
 0x378   : > { %v876_v53 = vpop.xlane.xlu0 %875 }
 0x379   : > { %v881_v54 = vadd.f32 %v876_v53, %v869_v52 }
 0x37b   : > { %886 = vst.msk [vmem:[#allocation3 + $0x10] sm:$0xff] %vm828_vm5, %v881_v54  ;;  %v901_v0 = vpop.xlane.xlu1 %900 }
 0x37c   : > { %v878_v57 = vpop.xlane.xlu0 %877 }
 0x37d   : > { %v882_v58 = vadd.f32 %v878_v57, %v870_v55  ;;  %v889_v62 = vld [vmem:[#allocation3 + $0x8] sm:$0xff] }
 0x37e   : > { %v888_v59 = vld [vmem:[#allocation3] sm:$0xff] }
 0x37f   : > { %v904_v60 = vadd.f32 %v897_v56, %v888_v59  ;;  %887 = vst.msk [vmem:[#allocation3 + $0x18] sm:$0xff] %vm828_vm5, %v882_v58 }
 0x380   : > { %v899_v61 = vpop.xlane.xlu0 %898 }
 0x381   : > { %909 = vst.msk [vmem:[#allocation3] sm:$0xff] %vm908_vm7, %v904_v60  ;;  %v905_v63 = vadd.f32 %v899_v61, %v889_v62 }
 0x382   : > { %v890_v1 = vld [vmem:[#allocation3 + $0x10] sm:$0xff] }
 0x383   : > { %v906_v2 = vadd.f32 %v901_v0, %v890_v1  ;;  %910 = vst.msk [vmem:[#allocation3 + $0x8] sm:$0xff] %vm908_vm7, %v905_v63 }
 0x384   : > { %v903_v3 = vpop.xlane.xlu0 %902 }
 0x385   : > { %911 = vst.msk [vmem:[#allocation3 + $0x10] sm:$0xff] %vm908_vm7, %v906_v2 }
 0x386   : > { %v891_v4 = vld [vmem:[#allocation3 + $0x18] sm:$0xff] }
 0x387   : > { %v907_v5 = vadd.f32 %v903_v3, %v891_v4 }
 0x388   : > { %v922_v8 = vld [vmem:[#allocation3] sm:$0xff] }
 0x389   : > { %912 = vst.msk [vmem:[#allocation3 + $0x18] sm:$0xff] %vm908_vm7, %v907_v5  ;;  %v926_v9 = vmul.f32 0.0625, %v922_v8 }
 0x38a   : > { %v923_v10 = vld [vmem:[#allocation3 + $0x8] sm:$0xff] }
 0x38b   : > { %v930_v12 = vmul.f32 %v926_v9, %v926_v9  ;;  %v927_v13 = vmul.f32 0.0625, %v923_v10  ;;  %v962_v50 = vadd.f32 %v926_v9, %v1740_v26 }
 0x38c   : > { %v924_v14 = vld [vmem:[#allocation3 + $0x10] sm:$0xff] }
 0x38d   : > { %938 = vrot.lane.b32.xlu1 %v930_v12, %s1491_s13  ;;  %v931_v16 = vmul.f32 %v927_v13, %v927_v13  ;;  %v928_v17 = vmul.f32 0.0625, %v924_v14  ;;  %v963_v53 = vadd.f32 %v927_v13, %v1737_v25 }
 0x38f   : > { %940 = vrot.lane.b32.xlu0 %v931_v16, %s1491_s13  ;;  %v932_v18 = vmul.f32 %v928_v17, %v928_v17  ;;  %v964_v56 = vadd.f32 %v928_v17, %v1744_v27 }
 0x390   : > { %v925_v19 = vld [vmem:[#allocation3 + $0x18] sm:$0xff] }
 0x391   : > { %942 = vrot.lane.b32.xlu1 %v932_v18, %s1491_s13  ;;  %v929_v20 = vmul.f32 0.0625, %v925_v19 }
 0x393   : > { %v933_v21 = vmul.f32 %v929_v20, %v929_v20  ;;  %v965_v26 = vadd.f32 %v929_v20, %v1747_v28 }
 0x395   : > { %944 = vrot.lane.b32.xlu1 %v933_v21, %s1491_s13 }
 0x3ff   : > { %v939_v22 = vpop.permute.xlu1 %938 }
 0x400   : > { %v950_v23 = vsub.f32 %v926_v9, %v939_v22 }
 0x401   : > { %v941_v24 = vpop.permute.xlu0 %940 }
 0x402   : > { %v954_v29 = vmax.f32 %v950_v23, 0.0  ;;  %v951_v30 = vsub.f32 %v927_v13, %v941_v24 }
 0x403   : > { %v943_v31 = vpop.permute.xlu1 %942 }
 0x404   : > { %v970_v32 = vadd.f32 1e-05, %v954_v29  ;;  %v955_v33 = vmax.f32 %v951_v30, 0.0  ;;  %v952_v34 = vsub.f32 %v928_v17, %v943_v31 }
 0x406   : > { %1448 = vrsqrt.f32 %v970_v32  ;;  %v971_v35 = vadd.f32 1e-05, %v955_v33  ;;  %v956_v36 = vmax.f32 %v952_v34, 0.0 }
 0x407   : > { %v945_v37 = vpop.permute.xlu1 %944 }
 0x408   : > { %1450 = vrsqrt.f32 %v971_v35  ;;  %v972_v38 = vadd.f32 1e-05, %v956_v36  ;;  %v953_v39 = vsub.f32 %v929_v20, %v945_v37 }
 0x40a   : > { %1452 = vrsqrt.f32 %v972_v38  ;;  %v957_v40 = vmax.f32 %v953_v39, 0.0 }
 0x40c   : > { %v973_v41 = vadd.f32 1e-05, %v957_v40 }
 0x40e   : > { %1454 = vrsqrt.f32 %v973_v41 }
 0x410   : > { %v1449_v42 = vpop.eup %1448 }
 0x411   : > { %v978_v43 = vmul.f32 %v1449_v42, %v1586_v6 }
 0x412   : > { %v1451_v44 = vpop.eup %1450 }
 0x413   : > { %986 = vrot.lane.b32.xlu0 %v978_v43, %s1492_s14  ;;  %v979_v45 = vmul.f32 %v1451_v44, %v1607_v11 }
 0x414   : > { %v1453_v46 = vpop.eup %1452 }
 0x415   : > { %988 = vrot.lane.b32.xlu1 %v979_v45, %s1492_s14  ;;  %v980_v47 = vmul.f32 %v1453_v46, %v1591_v7 }
 0x417   : > { %990 = vrot.lane.b32.xlu0 %v980_v47, %s1492_s14 }
 0x418   : > { %v1455_v48 = vpop.eup %1454 }
 0x419   : > { %v981_v49 = vmul.f32 %v1455_v48, %v1619_v15 }
 0x41b   : > { %992 = vrot.lane.b32.xlu1 %v981_v49, %s1492_s14 }
 0x485   : > { %v987_v51 = vpop.permute.xlu0 %986 }
 0x486   : > { %998 = vst.msk [vmem:[#allocation3] sm:$0xff] %vm828_vm5, %v987_v51  ;;  %v1006_v52 = vmul.f32 %v987_v51, %v962_v50 }
 0x487   : > { %v989_v54 = vpop.permute.xlu1 %988 }
 0x488   : > { %999 = vst.msk [vmem:[#allocation3 + $0x8] sm:$0xff] %vm828_vm5, %v989_v54  ;;  %v1007_v55 = vmul.f32 %v989_v54, %v963_v53  ;;  %1014 = vrot.lane.b32.xlu0 %v1006_v52, %s1493_s15 }
 0x489   : > { %v991_v57 = vpop.permute.xlu0 %990 }
 0x48a   : > { %1000 = vst.msk [vmem:[#allocation3 + $0x10] sm:$0xff] %vm828_vm5, %v991_v57  ;;  %v1008_v58 = vmul.f32 %v991_v57, %v964_v56  ;;  %1016 = vrot.lane.b32.xlu1 %v1007_v55, %s1493_s15 }
 0x48c   : > { %1018 = vrot.lane.b32.xlu0 %v1008_v58, %s1493_s15 }
 0x48d   : > { %v993_v59 = vpop.permute.xlu1 %992 }
 0x48e   : > { %1001 = vst.msk [vmem:[#allocation3 + $0x18] sm:$0xff] %vm828_vm5, %v993_v59  ;;  %v1009_v25 = vmul.f32 %v993_v59, %v965_v26 }
 0x490   : > { %1020 = vrot.lane.b32.xlu1 %v1009_v25, %s1493_s15 }
 0x4fa   : > { %v1015_v60 = vpop.permute.xlu0 %1014 }
 0x4fb   : > { %v1026_v61 = vsub.f32 %v1586_v6, %v1015_v60 }
 0x4fc   : > { %v1017_v62 = vpop.permute.xlu1 %1016 }
 0x4fd   : > { %v1027_v63 = vsub.f32 %v1607_v11, %v1017_v62  ;;  %1034 = vrot.lane.b32.xlu0 %v1026_v61, %s1492_s14 }
 0x4fe   : > { %v1019_v27 = vpop.permute.xlu0 %1018 }
 0x4ff   : > { %v1028_v0 = vsub.f32 %v1591_v7, %v1019_v27  ;;  %1036 = vrot.lane.b32.xlu1 %v1027_v63, %s1492_s14 }
 0x501   : > { %1038 = vrot.lane.b32.xlu0 %v1028_v0, %s1492_s14 }
 0x502   : > { %v1021_v28 = vpop.permute.xlu1 %1020 }
 0x503   : > { %v1029_v1 = vsub.f32 %v1619_v15, %v1021_v28 }
 0x505   : > { %1040 = vrot.lane.b32.xlu1 %v1029_v1, %s1492_s14 }
 0x56f   : > { %v1035_v2 = vpop.permute.xlu0 %1034 }
 0x570   : > { %1046 = vst.msk [vmem:[#allocation3] sm:$0xff] %vm908_vm7, %v1035_v2 }
 0x571   : > { %v1037_v6 = vpop.permute.xlu1 %1036 }
 0x572   : > { %1047 = vst.msk [vmem:[#allocation3 + $0x8] sm:$0xff] %vm908_vm7, %v1037_v6 }
 0x573   : > { %v1039_v11 = vpop.permute.xlu0 %1038 }
 0x574   : > { %1048 = vst.msk [vmem:[#allocation3 + $0x10] sm:$0xff] %vm908_vm7, %v1039_v11 }
 0x577   : > { %v1041_v3 = vpop.permute.xlu1 %1040 }
 0x578   : > { %1049 = vst.msk [vmem:[#allocation3 + $0x18] sm:$0xff] %vm908_vm7, %v1041_v3 }
 0x579 PF: > { %p1273_p5 = scmp.ne.s32.totalorder %s1478_s29, 1 }
 0x57a   : > { %v1054_v15 = vld [vmem:[#allocation3] sm:$0xff] (!%p1273_p5)  ;;  %v1494_v4 = vmov (!%p1273_p5), 0   ;;  %v1055_v5 = vld [vmem:[#allocation3 + $0x8] sm:$0xff] (!%p1273_p5)  ;;  %v1495_v8 = vmov (!%p1273_p5), 1   ;;  %v1114_v14 = vld [vmem:[%s1825_s6 + $0x10] sm:$0xff] (!%p1273_p5)  ;;  %v1155_v55 = vlaneseq (!%p1273_p5) }
 0x57b   : > { %1053 = sbr.rel (%p1273_p5) target bundleno = 1579 (0x62b), region = 72  ;;  %v1056_v7 = vld [vmem:[#allocation3 + $0x10] sm:$0xff] (!%p1273_p5)  ;;  %1457 = vset.pattern.permute.xlu1 (!%p1273_p5), %v1494_v4  ;;  %1456 = vset.pattern.permute.xlu0 (!%p1273_p5), %v1494_v4  ;;  %v1113_v10 = vld [vmem:[%s1825_s6 + $0x8] sm:$0xff] (!%p1273_p5)  ;;  %v1112_v12 = vld [vmem:[%s1825_s6] sm:$0xff] (!%p1273_p5) }
 0x57c   : > { %1076 = vperm.xlu1 (!%p1273_p5), %1457, %v1056_v7   ;;  %1066 = vperm.xlu0 (!%p1273_p5), %1456, %v1054_v15   ;;  %v1149_v13 = vld [vmem:[#allocation6] sm:$0x1] (!%p1273_p5)  ;;  %v1115_v16 = vld [vmem:[%s1825_s6 + $0x18] sm:$0xff] (!%p1273_p5)  ;;  %v1061_v24 = vld [vmem:[#allocation5 + $0x8] sm:$0xff] (!%p1273_p5)  ;;  %v1156_v58 = vshrl.u32 (!%p1273_p5), %v1155_v55, 7 }
 0x57d   : > { %v1060_v21 = vld [vmem:[#allocation5] sm:$0xff] (!%p1273_p5)  ;;  %v1062_v30 = vld [vmem:[#allocation5 + $0x10] sm:$0xff] (!%p1273_p5)  ;;  %v1063_v33 = vld [vmem:[#allocation5 + $0x18] sm:$0xff] (!%p1273_p5) }
 0x57e   : > { %v1157_v25 = vsub.s32 (!%p1273_p5), 0, %v1156_v58 }
 0x57f   : > { %v1057_v9 = vld [vmem:[#allocation3 + $0x18] sm:$0xff] (!%p1273_p5) }
 0x580   : > { %1458 = vset.pattern.permute.xlu1 (!%p1273_p5), %v1495_v8  ;;  %1071 = vperm.xlu0 (!%p1273_p5), %1456, %v1055_v5  }
 0x581   : > { %1089 = vperm.xlu1 (!%p1273_p5), %1458, %v1054_v15  }
 0x584   : > { %1459 = vset.pattern.permute.xlu0 %v1495_v8 }
 0x585   : > { %1460 = vset.pattern.permute.xlu1 %v1494_v4  ;;  %1093 = vperm.xlu0 %1459, %v1055_v5  }
 0x586   : > { %1081 = vperm.xlu1 %1460, %v1057_v9  }
 0x589   : > { %1101 = vperm.xlu0 %1459, %v1057_v9  }
 0x58a   : > { %1461 = vset.pattern.permute.xlu1 %v1495_v8 }
 0x58b   : > { %1097 = vperm.xlu1 %1461, %v1056_v7  }
 0x58d   : > { %1463 = vset.pattern.permute.xlu0 %v1494_v4 }
 0x58e   : > { %1123 = vperm.xlu0 %1463, %v1113_v10  }
 0x58f   : > { %1462 = vset.pattern.permute.xlu1 %v1494_v4 }
 0x590   : > { %1118 = vperm.xlu1 %1462, %v1112_v12  }
 0x592   : > { %1152 = vperm.xlu0 %1463, %v1149_v13  }
 0x594   : > { %1128 = vperm.xlu1 %1462, %v1114_v14  }
 0x598   : > { %1133 = vperm.xlu1 %1462, %v1115_v16  }
 0x5fb   : > { %v1077_v17 = vpop.permute.xlu1 %1076  ;;  %v1067_v18 = vpop.permute.xlu0 %1066 }
 0x5fc   : > { %v1084_v29 = vmul.f32 %v1067_v18, %v1060_v21  ;;  %v1086_v35 = vmul.f32 %v1077_v17, %v1062_v30 }
 0x5ff   : > { %v1072_v19 = vpop.permute.xlu0 %1071 }
 0x600   : > { %v1090_v20 = vpop.permute.xlu1 %1089  ;;  %v1085_v31 = vmul.f32 %v1072_v19, %v1061_v24 }
 0x601   : > { %v1104_v36 = vadd.f32 %v1090_v20, %v1084_v29 }
 0x603   : > { %v1108_v41 = vmax.f32 %v1104_v36, 0.0 }
 0x604   : > { %v1094_v22 = vpop.permute.xlu0 %1093 }
 0x605   : > { %v1082_v23 = vpop.permute.xlu1 %1081  ;;  %v1105_v37 = vadd.f32 %v1094_v22, %v1085_v31 }
 0x606   : > { %v1087_v38 = vmul.f32 %v1082_v23, %v1063_v33 }
 0x607   : > { %v1109_v43 = vmax.f32 %v1105_v37, 0.0 }
 0x608   : > { %v1102_v34 = vpop.permute.xlu0 %1101 }
 0x609   : > { %v1107_v44 = vadd.f32 %v1102_v34, %v1087_v38 }
 0x60a   : > { %v1098_v32 = vpop.permute.xlu1 %1097 }
 0x60b   : > { %v1106_v39 = vadd.f32 %v1098_v32, %v1086_v35  ;;  %v1111_v50 = vmax.f32 %v1107_v44, 0.0 }
 0x60d   : > { %v1124_v42 = vpop.permute.xlu0 %1123  ;;  %v1110_v45 = vmax.f32 %v1106_v39, 0.0 }
 0x60e   : > { %v1137_v48 = vmul.f32 %v1124_v42, %v1109_v43 }
 0x60f   : > { %v1119_v40 = vpop.permute.xlu1 %1118 }
 0x610   : > { %v1136_v46 = vmul.f32 %v1119_v40, %v1108_v41 }
 0x611   : > { %v1153_v61 = vpop.permute.xlu0 %1152 }
 0x612   : > { %v1140_v51 = vadd.f32 %v1137_v48, %v1136_v46  ;;  %v1158_v63 = vrot.slane %v1153_v61, %v1157_v25 }
 0x613   : > { %v1129_v47 = vpop.permute.xlu1 %1128 }
 0x614   : > { %v1138_v49 = vmul.f32 %v1129_v47, %v1110_v45 }
 0x616   : > { %v1141_v53 = vadd.f32 %v1140_v51, %v1138_v49 }
 0x617   : > { %v1134_v52 = vpop.permute.xlu1 %1133 }
 0x618   : > { %v1139_v54 = vmul.f32 %v1134_v52, %v1111_v50 }
 0x61a   : > { %v1142_v56 = vadd.f32 %v1141_v53, %v1139_v54 }
 0x61c   : > { %v1143_v57 = vrot.slane %v1142_v56, 4 }
 0x61e   : > { %v1144_v26 = vadd.f32 %v1143_v57, %v1142_v56 }
 0x620   : > { %v1145_v59 = vrot.slane %v1144_v26, 2 }
 0x622   : > { %v1146_v60 = vadd.f32 %v1145_v59, %v1144_v26 }
 0x624   : > { %v1147_v62 = vrot.slane %v1146_v60, 1 }
 0x626   : > { %v1148_v27 = vadd.f32 %v1147_v62, %v1146_v60 }
 0x628   : > { %v1159_v0 = vadd.f32 %v1158_v63, %v1148_v27 }
 0x62a   : > { %1160 = vst [vmem:[%s1827_s8] sm:$0x1] %v1159_v0 }
 0x62b PF: > { %s20_s9 = sadd.s32 1, %s1486_s9   ;;  %s1830_s29 = smov %s1482_s30 }
 0x62c   : > { %p17_p6 = scmp.ge.s32.totalorder %s20_s9, 4   ;;  %s1831_s30 = smov %s1833_s7 }
 0x62e   :  { %19 = sbr.rel (!%p17_p6) target bundleno = 3 (0x3), region = 107 }

</bundles_post_ra>
